<compile_context>
chip_gen: v6e
topology: v6e:2x2x1
jax: 0.10.0
libtpu: 0.0.40
codegen_flags: <defaults>
</compile_context>

<pallas_src>
import functools

import jax
import jax.numpy as jnp
from jax.experimental import pallas as pl
from jax.experimental.pallas import tpu as pltpu

LANE = 128                      # lane width: pad channel dims to multiples of this
ROW = 16                        # row-tile alignment (bf16 sublane packing)
VMEM_LIMIT_BYTES = 48 << 20     # safe on v7x (64 MiB physical); raise on v5e/v6e
_FUSED_MAX_NODES = 2048         # fused fast path when padded N <= this (A <= 8 MiB bf16)


def _round_up(x, m):
    return ((x + m - 1) // m) * m


def _pad2(x, rows, cols):
    p = jnp.zeros((rows, cols), x.dtype)
    return p.at[: x.shape[0], : x.shape[1]].set(x)


def _choose_tiles(n, block_rows, block_k):
    """Pick (tm, tk): tk lane-dense (mult of 128), tm mult of ROW dividing tk."""
    tk = max(LANE, min(_round_up(block_k, LANE), _round_up(n, LANE)))
    tm = max(ROW, min(_round_up(block_rows, ROW), tk))
    while tk % tm:
        tm -= ROW
    return tm, tk


def _resident_spec(shape, index_map):
    """BlockSpec for a constant-index resident operand; single-buffered."""
    try:
        return pl.BlockSpec(shape, index_map, pipeline_mode=pl.Buffered(1))
    except (TypeError, AttributeError):   # older jax without pipeline_mode
        return pl.BlockSpec(shape, index_map)


# ---------------------------------------------------------------------------
# Kernels
# ---------------------------------------------------------------------------
def _xw_kernel(x_ref, w_ref, o_ref):
    # XW1 tile = X_tile @ W1   (bf16 in, f32 MXU accumulation, bf16 out)
    o_ref[...] = jnp.dot(
        x_ref[...], w_ref[...], preferred_element_type=jnp.float32
    ).astype(o_ref.dtype)


def _layer1_kernel(a_ref, xw_ref, b1_ref, w2_ref, o_ref, acc_ref):
    # Accumulate A_tile @ XW1 over K tiles; finalize with relu(+b1) @ W2.
    k = pl.program_id(1)

    @pl.when(k == 0)
    def _():
        acc_ref[...] = jnp.zeros_like(acc_ref)

    acc_ref[...] += jnp.dot(
        a_ref[...], xw_ref[...], preferred_element_type=jnp.float32
    )

    @pl.when(k == pl.num_programs(1) - 1)
    def _():
        h = jnp.maximum(acc_ref[...] + b1_ref[...], 0.0)
        o_ref[...] = jnp.dot(
            h.astype(w2_ref.dtype), w2_ref[...], preferred_element_type=jnp.float32
        ).astype(o_ref.dtype)


def _layer2_kernel(a_ref, hw_ref, b2_ref, o_ref, acc_ref):
    # Accumulate A_tile @ HW2 over K tiles; finalize with + b2.
    k = pl.program_id(1)

    @pl.when(k == 0)
    def _():
        acc_ref[...] = jnp.zeros_like(acc_ref)

    acc_ref[...] += jnp.dot(
        a_ref[...], hw_ref[...], preferred_element_type=jnp.float32
    )

    @pl.when(k == pl.num_programs(1) - 1)
    def _():
        o_ref[...] = (acc_ref[...] + b2_ref[...]).astype(o_ref.dtype)


def _fused_kernel(a_ref, x_ref, w1_ref, b1_ref, w2_ref, b2_ref, o_ref):
    # Small-N fast path: both GCN layers in one call; A read from HBM once.
    xw1 = jnp.dot(x_ref[...], w1_ref[...], preferred_element_type=jnp.float32)
    ax = jnp.dot(a_ref[...], xw1.astype(a_ref.dtype),
                 preferred_element_type=jnp.float32)
    h = jnp.maximum(ax + b1_ref[...], 0.0)
    hw2 = jnp.dot(h.astype(w2_ref.dtype), w2_ref[...],
                  preferred_element_type=jnp.float32)
    out = jnp.dot(a_ref[...], hw2.astype(a_ref.dtype),
                  preferred_element_type=jnp.float32)
    o_ref[...] = (out + b2_ref[...]).astype(o_ref.dtype)


# ---------------------------------------------------------------------------
# Glue: normalized adjacency built directly at the padded shape (plain JAX)
# ---------------------------------------------------------------------------
def normalized_adjacency_padded(edge_index, num_nodes, rows_pad, cols_pad,
                                dtype=jnp.bfloat16):
    row, col = edge_index[0], edge_index[1]
    loop = jnp.arange(num_nodes, dtype=edge_index.dtype)
    row = jnp.concatenate([row, loop])
    col = jnp.concatenate([col, loop])
    deg = jnp.zeros((num_nodes,), jnp.float32).at[col].add(1.0)
    dinv = jnp.where(deg > 0.0, 1.0 / jnp.sqrt(deg), 0.0)
    w = dinv[col] * dinv[row]
    a = jnp.zeros((rows_pad, cols_pad), jnp.float32).at[col, row].add(w)
    return a.astype(dtype)


# ---------------------------------------------------------------------------
# Forward pass
# ---------------------------------------------------------------------------
@functools.partial(
    jax.jit, static_argnames=("block_rows", "block_k", "fuse_small")
)
def gcn_forward(x, edge_index, w1, b1, w2, b2, *,
                block_rows=256, block_k=2048, fuse_small=True):
    n, in_c = x.shape
    hid_c = w1.shape[1]
    out_c = w2.shape[1]

    cin_p = _round_up(in_c, LANE)
    hid_p = _round_up(hid_c, LANE)
    outc_p = _round_up(out_c, LANE)

    tm, tk = _choose_tiles(n, block_rows, block_k)
    n_pad = _round_up(n, tk)          # node dim padding; tm | tk | n_pad
    n_row_tiles = n_pad // tm
    n_k_tiles = n_pad // tk

    # Operands: bf16 with zero padding (benign: padded A rows/cols are zero,
    # padded bias tails are zero, padded output rows are sliced off).
    a_bf = normalized_adjacency_padded(edge_index, n, n_pad, n_pad, jnp.bfloat16)
    x_bf = _pad2(x, n_pad, cin_p).astype(jnp.bfloat16)
    w1_bf = _pad2(w1, cin_p, hid_p).astype(jnp.bfloat16)
    w2_bf = _pad2(w2, hid_p, outc_p).astype(jnp.bfloat16)
    b1_p = _pad2(b1.reshape(1, -1), 1, hid_p)       # f32, zero tail
    b2_p = _pad2(b2.reshape(1, -1), 1, outc_p)      # f32, zero tail

    # ---------------- Fused small-N fast path: read A once ----------------
    if fuse_small and n_pad <= _FUSED_MAX_NODES:
        fused_cost = pl.CostEstimate(
            flops=2 * n_pad * (cin_p * hid_p + n_pad * hid_p
                               + hid_p * outc_p + n_pad * outc_p),
            transcendentals=0,
            bytes_accessed=(2 * n_pad * n_pad + 2 * n_pad * cin_p
                            + 2 * cin_p * hid_p + 2 * hid_p * outc_p
                            + 4 * n_pad * outc_p),
        )
        out_pad = pl.pallas_call(
            _fused_kernel,
            out_shape=jax.ShapeDtypeStruct((n_pad, outc_p), jnp.float32),
            cost_estimate=fused_cost,
            compiler_params=pltpu.CompilerParams(
                vmem_limit_bytes=VMEM_LIMIT_BYTES),
        )(a_bf, x_bf, w1_bf, b1_p, w2_bf, b2_p)
        return out_pad[:n, :out_c]

    # ---------------- General path: row x K tiled propagation -------------
    cparams1 = pltpu.CompilerParams(
        dimension_semantics=("parallel",), vmem_limit_bytes=VMEM_LIMIT_BYTES)
    cparams2 = pltpu.CompilerParams(
        dimension_semantics=("parallel", "arbitrary"),
        vmem_limit_bytes=VMEM_LIMIT_BYTES)

    # Stage 1: XW1 = X @ W1   (computed exactly once; row-tiled, lane-dense)
    xw1 = pl.pallas_call(
        _xw_kernel,
        out_shape=jax.ShapeDtypeStruct((n_pad, hid_p), jnp.bfloat16),
        grid=(n_row_tiles,),
        in_specs=[
            pl.BlockSpec((tm, cin_p), lambda i: (i, 0)),
            _resident_spec((cin_p, hid_p), lambda i: (0, 0)),
        ],
        out_specs=pl.BlockSpec((tm, hid_p), lambda i: (i, 0)),
        cost_estimate=pl.CostEstimate(
            flops=2 * n_pad * cin_p * hid_p,
            transcendentals=0,
            bytes_accessed=2 * n_pad * (cin_p + hid_p) + 2 * cin_p * hid_p),
        compiler_params=cparams1,
    )(x_bf, w1_bf)

    # Stage 2: HW2 = relu(A @ XW1 + b1) @ W2   (rows parallel, K arbitrary)
    hw2 = pl.pallas_call(
        _layer1_kernel,
        out_shape=jax.ShapeDtypeStruct((n_pad, outc_p), jnp.bfloat16),
        grid=(n_row_tiles, n_k_tiles),
        in_specs=[
            pl.BlockSpec((tm, tk), lambda i, k: (i, k)),          # A tile (streamed)
            pl.BlockSpec((tk, hid_p), lambda i, k: (k, 0)),       # XW1 K block
            _resident_spec((1, hid_p), lambda i, k: (0, 0)),      # b1 (resident)
            _resident_spec((hid_p, outc_p), lambda i, k: (0, 0)), # W2 (resident)
        ],
        out_specs=pl.BlockSpec((tm, outc_p), lambda i, k: (i, 0)),
        scratch_shapes=[pltpu.VMEM((tm, hid_p), jnp.float32)],
        cost_estimate=pl.CostEstimate(
            flops=2 * n_pad * n_pad * hid_p + 2 * n_pad * hid_p * outc_p,
            transcendentals=0,
            bytes_accessed=(2 * n_pad * n_pad
                            + 2 * n_row_tiles * n_pad * hid_p
                            + 2 * hid_p * outc_p + 2 * n_pad * outc_p)),
        compiler_params=cparams2,
    )(a_bf, xw1, b1_p, w2_bf)

    # Stage 3: OUT = A @ HW2 + b2   (rows parallel, K arbitrary, f32 output)
    out_pad = pl.pallas_call(
        _layer2_kernel,
        out_shape=jax.ShapeDtypeStruct((n_pad, outc_p), jnp.float32),
        grid=(n_row_tiles, n_k_tiles),
        in_specs=[
            pl.BlockSpec((tm, tk), lambda i, k: (i, k)),          # A tile (streamed)
            pl.BlockSpec((tk, outc_p), lambda i, k: (k, 0)),      # HW2 K block
            _resident_spec((1, outc_p), lambda i, k: (0, 0)),     # b2 (resident)
        ],
        out_specs=pl.BlockSpec((tm, outc_p), lambda i, k: (i, 0)),
        scratch_shapes=[pltpu.VMEM((tm, outc_p), jnp.float32)],
        cost_estimate=pl.CostEstimate(
            flops=2 * n_pad * n_pad * outc_p,
            transcendentals=0,
            bytes_accessed=(2 * n_pad * n_pad
                            + 2 * n_row_tiles * n_pad * outc_p
                            + 4 * n_pad * outc_p)),
        compiler_params=cparams2,
    )(a_bf, hw2, b2_p)

    return out_pad[:n, :out_c]


# ---------------------------------------------------------------------------
# Parameter init (deterministic glorot-like weights, zero biases)
# ---------------------------------------------------------------------------
def init_params(key, in_c, hid_c, out_c):
    k1, k2 = jax.random.split(key)
    s1 = jnp.sqrt(6.0 / (in_c + hid_c))
    s2 = jnp.sqrt(6.0 / (hid_c + out_c))
    w1 = jax.random.uniform(k1, (in_c, hid_c), jnp.float32, -s1, s1)
    b1 = jnp.zeros((1, hid_c), jnp.float32)
    w2 = jax.random.uniform(k2, (hid_c, out_c), jnp.float32, -s2, s2)
    b2 = jnp.zeros((1, out_c), jnp.float32)
    return w1, b1, w2, b2


if __name__ == "__main__":
    key = jax.random.PRNGKey(0)
    k_x, k_e, k_p = jax.random.split(key, 3)

    num_nodes = 200
    in_channels = 8
    hidden_channels = 32
    out_channels = 8
    num_edges = 600

    x = jax.random.normal(k_x, (num_nodes, in_channels), jnp.float32)
    edge_index = jax.random.randint(
        k_e, (2, num_edges), 0, num_nodes, dtype=jnp.int32
    )
    w1, b1, w2, b2 = init_params(k_p, in_channels, hidden_channels, out_channels)

    # Tiled path: small tiles -> multi-step (rows x K) grid; exercises the
    # pl.when init/finalize accumulator and the pipelined, K-tiled DMA path.
    out_tiled = gcn_forward(x, edge_index, w1, b1, w2, b2,
                            block_rows=32, block_k=128, fuse_small=False)
    # Fused small-N fast path (A streamed from HBM exactly once).
    out_fused = gcn_forward(x, edge_index, w1, b1, w2, b2)
    out_tiled, out_fused = jax.block_until_ready((out_tiled, out_fused))
    assert out_tiled.shape == (num_nodes, out_channels)
    assert out_fused.shape == (num_nodes, out_channels)

    # References.
    a_hat = normalized_adjacency_padded(
        edge_index, num_nodes, num_nodes, num_nodes, jnp.float32)

    # (a) Exact-semantics f32 reference (the module's forward); loose tol since
    #     the kernel carries operands in bf16.
    h32 = jnp.maximum(a_hat @ (x @ w1) + b1, 0.0)
    ref32 = a_hat @ (h32 @ w2) + b2

    # (b) Precision-mirrored reference (bf16 operands, f32 accumulation).
    rt = lambda v: v.astype(jnp.bfloat16).astype(jnp.float32)
    a_r = rt(a_hat)
    xw1_r = rt(rt(x) @ rt(w1))
    h_r = jnp.maximum(a_r @ xw1_r + b1, 0.0)
    hw2_r = rt(rt(h_r) @ rt(w2))
    ref_bf = a_r @ hw2_r + b2

    for out in (out_tiled, out_fused):
        assert jnp.allclose(out, ref32, atol=5e-2, rtol=5e-2)
        assert jnp.allclose(out, ref_bf, atol=1e-2, rtol=1e-2)
    assert jnp.allclose(out_tiled, out_fused, atol=1e-2, rtol=1e-2)

    print("KERNEL_OK")
</pallas_src>

<mosaic_0001>
module attributes {stable_mosaic.version = 11 : i64} {
  func.func private @main(%arg0: i32) attributes {dimension_semantics = [#tpu.dimension_semantics<core_parallel>], iteration_bounds = array<i64: 2>, tpu.core_type = #tpu.core_type<sc_scalar_subcore>, window_params = []} {
    return
  }
}

module attributes {stable_mosaic.version = 11 : i64} {
  func.func private @main(%arg0: i32) attributes {dimension_semantics = [#tpu.dimension_semantics<core_parallel>], iteration_bounds = array<i64: 2>, tpu.core_type = #tpu.core_type<sc_scalar_subcore>, window_params = []} {
    return
  }
}

module attributes {stable_mosaic.version = 11 : i64} {
  func.func @_xw_kernel(%arg0: i32, %arg1: memref<32x128xbf16, #tpu.memory_space<vmem>>, %arg2: memref<128x128xbf16, #tpu.memory_space<vmem>>, %arg3: memref<32x128xbf16, #tpu.memory_space<vmem>>) attributes {dimension_semantics = [#tpu.dimension_semantics<parallel>], iteration_bounds = array<i64: 8>, scalar_prefetch = 0 : i64, scratch_operands = 0 : i64, tpu.core_type = #tpu.core_type<tc>, window_params = [{transform_indices = @transform_0, window_bounds = array<i64: 32, 128>}, {pipeline_mode = #tpu.pipeline_mode<synchronous>, transform_indices = @transform_1, window_bounds = array<i64: 128, 128>}, {transform_indices = @transform_2, window_bounds = array<i64: 32, 128>}]} {
    %c0 = arith.constant 0 : index
    %c0_0 = arith.constant 0 : index
    %0 = vector.load %arg1[%c0, %c0_0] : memref<32x128xbf16, #tpu.memory_space<vmem>>, vector<32x128xbf16>
    %c0_1 = arith.constant 0 : index
    %c0_2 = arith.constant 0 : index
    %1 = vector.load %arg2[%c0_1, %c0_2] : memref<128x128xbf16, #tpu.memory_space<vmem>>, vector<128x128xbf16>
    %cst = arith.constant dense<0.000000e+00> : vector<32x128xf32>
    %2 = tpu.matmul %0, %1, %cst {dimension_numbers = #tpu.dot_dimension_numbers<[1], [0], [0], [1], [0, 0, 1, 1], [], []>} : vector<32x128xbf16>, vector<128x128xbf16>, vector<32x128xf32> -> vector<32x128xf32>
    %3 = arith.truncf %2 : vector<32x128xf32> to vector<32x128xbf16>
    %c0_3 = arith.constant 0 : index
    %c0_4 = arith.constant 0 : index
    %4 = vector.load %arg3[%c0_3, %c0_4] : memref<32x128xbf16, #tpu.memory_space<vmem>>, vector<32x128xbf16>
    tpu.vector_store %arg3[%c0_3, %c0_4], %3 {strides = array<i32>} : memref<32x128xbf16, #tpu.memory_space<vmem>>, vector<32x128xbf16>,
    return
  }
  func.func @transform_0(%arg0: i32) -> (i32, i32) {
    %c0_i32 = arith.constant 0 : i32
    %c0_i32_0 = arith.constant 0 : i32
    return %arg0, %c0_i32 : i32, i32
  }
  func.func @transform_1(%arg0: i32) -> (i32, i32) {
    %c0_i32 = arith.constant 0 : i32
    %c0_i32_0 = arith.constant 0 : i32
    %c0_i32_1 = arith.constant 0 : i32
    return %c0_i32, %c0_i32_0 : i32, i32
  }
  func.func @transform_2(%arg0: i32) -> (i32, i32) {
    %c0_i32 = arith.constant 0 : i32
    %c0_i32_0 = arith.constant 0 : i32
    return %arg0, %c0_i32 : i32, i32
  }
}

module attributes {stable_mosaic.version = 11 : i64} {
  func.func @_layer2_kernel(%arg0: i32, %arg1: i32, %arg2: memref<32x128xbf16, #tpu.memory_space<vmem>>, %arg3: memref<128x128xbf16, #tpu.memory_space<vmem>>, %arg4: memref<1x128xf32, #tpu.memory_space<vmem>>, %arg5: memref<32x128xf32, #tpu.memory_space<vmem>>, %arg6: memref<32x128xf32, #tpu.memory_space<vmem>>) attributes {dimension_semantics = [#tpu.dimension_semantics<parallel>, #tpu.dimension_semantics<arbitrary>], iteration_bounds = array<i64: 8, 2>, scalar_prefetch = 0 : i64, scratch_operands = 1 : i64, tpu.core_type = #tpu.core_type<tc>, window_params = [{transform_indices = @transform_0, window_bounds = array<i64: 32, 128>}, {transform_indices = @transform_1, window_bounds = array<i64: 128, 128>}, {pipeline_mode = #tpu.pipeline_mode<synchronous>, transform_indices = @transform_2, window_bounds = array<i64: 1, 128>}, {transform_indices = @transform_3, window_bounds = array<i64: 32, 128>}]} {
    %c0_i32 = arith.constant 0 : i32
    %0 = arith.cmpi eq, %arg1, %c0_i32 : i32
    %1 = arith.extui %0 : i1 to i32
    %c0_i32_0 = arith.constant 0 : i32
    %2 = arith.cmpi ne, %1, %c0_i32_0 : i32
    scf.if %2 {
      %cst_9 = arith.constant 0.000000e+00 : f32
      %12 = vector.broadcast %cst_9 : f32 to vector<32x128xf32>
      %c0_10 = arith.constant 0 : index
      %c0_11 = arith.constant 0 : index
      %13 = vector.load %arg6[%c0_10, %c0_11] : memref<32x128xf32, #tpu.memory_space<vmem>>, vector<32x128xf32>
      tpu.vector_store %arg6[%c0_10, %c0_11], %12 {strides = array<i32>} : memref<32x128xf32, #tpu.memory_space<vmem>>, vector<32x128xf32>,
    } else {
    }
    %c0 = arith.constant 0 : index
    %c0_1 = arith.constant 0 : index
    %3 = vector.load %arg6[%c0, %c0_1] : memref<32x128xf32, #tpu.memory_space<vmem>>, vector<32x128xf32>
    %c0_2 = arith.constant 0 : index
    %c0_3 = arith.constant 0 : index
    %4 = vector.load %arg2[%c0_2, %c0_3] : memref<32x128xbf16, #tpu.memory_space<vmem>>, vector<32x128xbf16>
    %c0_4 = arith.constant 0 : index
    %c0_5 = arith.constant 0 : index
    %5 = vector.load %arg3[%c0_4, %c0_5] : memref<128x128xbf16, #tpu.memory_space<vmem>>, vector<128x128xbf16>
    %cst = arith.constant dense<0.000000e+00> : vector<32x128xf32>
    %6 = tpu.matmul %4, %5, %cst {dimension_numbers = #tpu.dot_dimension_numbers<[1], [0], [0], [1], [0, 0, 1, 1], [], []>} : vector<32x128xbf16>, vector<128x128xbf16>, vector<32x128xf32> -> vector<32x128xf32>
    %7 = arith.addf %3, %6 : vector<32x128xf32>
    %c0_6 = arith.constant 0 : index
    %c0_7 = arith.constant 0 : index
    %8 = vector.load %arg6[%c0_6, %c0_7] : memref<32x128xf32, #tpu.memory_space<vmem>>, vector<32x128xf32>
    tpu.vector_store %arg6[%c0_6, %c0_7], %7 {strides = array<i32>} : memref<32x128xf32, #tpu.memory_space<vmem>>, vector<32x128xf32>,
    %c1_i32 = arith.constant 1 : i32
    %9 = arith.cmpi eq, %arg1, %c1_i32 : i32
    %10 = arith.extui %9 : i1 to i32
    %c0_i32_8 = arith.constant 0 : i32
    %11 = arith.cmpi ne, %10, %c0_i32_8 : i32
    scf.if %11 {
      %c0_9 = arith.constant 0 : index
      %c0_10 = arith.constant 0 : index
      %12 = vector.load %arg6[%c0_9, %c0_10] : memref<32x128xf32, #tpu.memory_space<vmem>>, vector<32x128xf32>
      %c0_11 = arith.constant 0 : index
      %c0_12 = arith.constant 0 : index
      %13 = vector.load %arg4[%c0_11, %c0_12] : memref<1x128xf32, #tpu.memory_space<vmem>>, vector<1x128xf32>
      %14 = vector.broadcast %13 : vector<1x128xf32> to vector<32x128xf32>
      %15 = arith.addf %12, %14 : vector<32x128xf32>
      %c0_13 = arith.constant 0 : index
      %c0_14 = arith.constant 0 : index
      %16 = vector.load %arg5[%c0_13, %c0_14] : memref<32x128xf32, #tpu.memory_space<vmem>>, vector<32x128xf32>
      tpu.vector_store %arg5[%c0_13, %c0_14], %15 {strides = array<i32>} : memref<32x128xf32, #tpu.memory_space<vmem>>, vector<32x128xf32>,
    } else {
    }
    return
  }
  func.func @transform_0(%arg0: i32, %arg1: i32) -> (i32, i32) {
    %c0_i32 = arith.constant 0 : i32
    return %arg0, %arg1 : i32, i32
  }
  func.func @transform_1(%arg0: i32, %arg1: i32) -> (i32, i32) {
    %c0_i32 = arith.constant 0 : i32
    %c0_i32_0 = arith.constant 0 : i32
    return %arg1, %c0_i32 : i32, i32
  }
  func.func @transform_2(%arg0: i32, %arg1: i32) -> (i32, i32) {
    %c0_i32 = arith.constant 0 : i32
    %c0_i32_0 = arith.constant 0 : i32
    %c0_i32_1 = arith.constant 0 : i32
    return %c0_i32, %c0_i32_0 : i32, i32
  }
  func.func @transform_3(%arg0: i32, %arg1: i32) -> (i32, i32) {
    %c0_i32 = arith.constant 0 : i32
    %c0_i32_0 = arith.constant 0 : i32
    return %arg0, %c0_i32 : i32, i32
  }
}

module attributes {stable_mosaic.version = 11 : i64} {
  func.func @_layer1_kernel(%arg0: i32, %arg1: i32, %arg2: memref<32x128xbf16, #tpu.memory_space<vmem>>, %arg3: memref<128x128xbf16, #tpu.memory_space<vmem>>, %arg4: memref<1x128xf32, #tpu.memory_space<vmem>>, %arg5: memref<128x128xbf16, #tpu.memory_space<vmem>>, %arg6: memref<32x128xbf16, #tpu.memory_space<vmem>>, %arg7: memref<32x128xf32, #tpu.memory_space<vmem>>) attributes {dimension_semantics = [#tpu.dimension_semantics<parallel>, #tpu.dimension_semantics<arbitrary>], iteration_bounds = array<i64: 8, 2>, scalar_prefetch = 0 : i64, scratch_operands = 1 : i64, tpu.core_type = #tpu.core_type<tc>, window_params = [{transform_indices = @transform_0, window_bounds = array<i64: 32, 128>}, {transform_indices = @transform_1, window_bounds = array<i64: 128, 128>}, {pipeline_mode = #tpu.pipeline_mode<synchronous>, transform_indices = @transform_2, window_bounds = array<i64: 1, 128>}, {pipeline_mode = #tpu.pipeline_mode<synchronous>, transform_indices = @transform_3, window_bounds = array<i64: 128, 128>}, {transform_indices = @transform_4, window_bounds = array<i64: 32, 128>}]} {
    %c0_i32 = arith.constant 0 : i32
    %0 = arith.cmpi eq, %arg1, %c0_i32 : i32
    %1 = arith.extui %0 : i1 to i32
    %c0_i32_0 = arith.constant 0 : i32
    %2 = arith.cmpi ne, %1, %c0_i32_0 : i32
    scf.if %2 {
      %cst_9 = arith.constant 0.000000e+00 : f32
      %12 = vector.broadcast %cst_9 : f32 to vector<32x128xf32>
      %c0_10 = arith.constant 0 : index
      %c0_11 = arith.constant 0 : index
      %13 = vector.load %arg7[%c0_10, %c0_11] : memref<32x128xf32, #tpu.memory_space<vmem>>, vector<32x128xf32>
      tpu.vector_store %arg7[%c0_10, %c0_11], %12 {strides = array<i32>} : memref<32x128xf32, #tpu.memory_space<vmem>>, vector<32x128xf32>,
    } else {
    }
    %c0 = arith.constant 0 : index
    %c0_1 = arith.constant 0 : index
    %3 = vector.load %arg7[%c0, %c0_1] : memref<32x128xf32, #tpu.memory_space<vmem>>, vector<32x128xf32>
    %c0_2 = arith.constant 0 : index
    %c0_3 = arith.constant 0 : index
    %4 = vector.load %arg2[%c0_2, %c0_3] : memref<32x128xbf16, #tpu.memory_space<vmem>>, vector<32x128xbf16>
    %c0_4 = arith.constant 0 : index
    %c0_5 = arith.constant 0 : index
    %5 = vector.load %arg3[%c0_4, %c0_5] : memref<128x128xbf16, #tpu.memory_space<vmem>>, vector<128x128xbf16>
    %cst = arith.constant dense<0.000000e+00> : vector<32x128xf32>
    %6 = tpu.matmul %4, %5, %cst {dimension_numbers = #tpu.dot_dimension_numbers<[1], [0], [0], [1], [0, 0, 1, 1], [], []>} : vector<32x128xbf16>, vector<128x128xbf16>, vector<32x128xf32> -> vector<32x128xf32>
    %7 = arith.addf %3, %6 : vector<32x128xf32>
    %c0_6 = arith.constant 0 : index
    %c0_7 = arith.constant 0 : index
    %8 = vector.load %arg7[%c0_6, %c0_7] : memref<32x128xf32, #tpu.memory_space<vmem>>, vector<32x128xf32>
    tpu.vector_store %arg7[%c0_6, %c0_7], %7 {strides = array<i32>} : memref<32x128xf32, #tpu.memory_space<vmem>>, vector<32x128xf32>,
    %c1_i32 = arith.constant 1 : i32
    %9 = arith.cmpi eq, %arg1, %c1_i32 : i32
    %10 = arith.extui %9 : i1 to i32
    %c0_i32_8 = arith.constant 0 : i32
    %11 = arith.cmpi ne, %10, %c0_i32_8 : i32
    scf.if %11 {
      %c0_9 = arith.constant 0 : index
      %c0_10 = arith.constant 0 : index
      %12 = vector.load %arg7[%c0_9, %c0_10] : memref<32x128xf32, #tpu.memory_space<vmem>>, vector<32x128xf32>
      %c0_11 = arith.constant 0 : index
      %c0_12 = arith.constant 0 : index
      %13 = vector.load %arg4[%c0_11, %c0_12] : memref<1x128xf32, #tpu.memory_space<vmem>>, vector<1x128xf32>
      %14 = vector.broadcast %13 : vector<1x128xf32> to vector<32x128xf32>
      %15 = arith.addf %12, %14 : vector<32x128xf32>
      %cst_13 = arith.constant 0.000000e+00 : f32
      %16 = vector.broadcast %cst_13 : f32 to vector<32x128xf32>
      %17 = arith.maximumf %15, %16 : vector<32x128xf32>
      %18 = arith.truncf %17 : vector<32x128xf32> to vector<32x128xbf16>
      %c0_14 = arith.constant 0 : index
      %c0_15 = arith.constant 0 : index
      %19 = vector.load %arg5[%c0_14, %c0_15] : memref<128x128xbf16, #tpu.memory_space<vmem>>, vector<128x128xbf16>
      %cst_16 = arith.constant dense<0.000000e+00> : vector<32x128xf32>
      %20 = tpu.matmul %18, %19, %cst_16 {dimension_numbers = #tpu.dot_dimension_numbers<[1], [0], [0], [1], [0, 0, 1, 1], [], []>} : vector<32x128xbf16>, vector<128x128xbf16>, vector<32x128xf32> -> vector<32x128xf32>
      %21 = arith.truncf %20 : vector<32x128xf32> to vector<32x128xbf16>
      %c0_17 = arith.constant 0 : index
      %c0_18 = arith.constant 0 : index
      %22 = vector.load %arg6[%c0_17, %c0_18] : memref<32x128xbf16, #tpu.memory_space<vmem>>, vector<32x128xbf16>
      tpu.vector_store %arg6[%c0_17, %c0_18], %21 {strides = array<i32>} : memref<32x128xbf16, #tpu.memory_space<vmem>>, vector<32x128xbf16>,
    } else {
    }
    return
  }
  func.func @transform_0(%arg0: i32, %arg1: i32) -> (i32, i32) {
    %c0_i32 = arith.constant 0 : i32
    return %arg0, %arg1 : i32, i32
  }
  func.func @transform_1(%arg0: i32, %arg1: i32) -> (i32, i32) {
    %c0_i32 = arith.constant 0 : i32
    %c0_i32_0 = arith.constant 0 : i32
    return %arg1, %c0_i32 : i32, i32
  }
  func.func @transform_2(%arg0: i32, %arg1: i32) -> (i32, i32) {
    %c0_i32 = arith.constant 0 : i32
    %c0_i32_0 = arith.constant 0 : i32
    %c0_i32_1 = arith.constant 0 : i32
    return %c0_i32, %c0_i32_0 : i32, i32
  }
  func.func @transform_3(%arg0: i32, %arg1: i32) -> (i32, i32) {
    %c0_i32 = arith.constant 0 : i32
    %c0_i32_0 = arith.constant 0 : i32
    %c0_i32_1 = arith.constant 0 : i32
    return %c0_i32, %c0_i32_0 : i32, i32
  }
  func.func @transform_4(%arg0: i32, %arg1: i32) -> (i32, i32) {
    %c0_i32 = arith.constant 0 : i32
    %c0_i32_0 = arith.constant 0 : i32
    return %arg0, %c0_i32 : i32, i32
  }
}

</mosaic_0001>

<bundles_post_ra>
// kernel: mul.1
= control target key start
LH: loop header
LB: loop body
LE: loop exit
PB: predicated region body
PF: predicated region fallthrough
CT: control target
= control target key end

     0   :  { %s34_s0 = inlined_call_operand.vmem [shape: f32[800], index: 0, kind: input, shape index: {}]   ;;  %s35_s1 = inlined_call_operand.vmem [shape: f32[800], index: 1, kind: input, shape index: {}]   ;;  %s36_s2 = inlined_call_operand.vmem [shape: f32[800], index: 2, kind: output, shape index: {}]  }
   0x1   :  { %v3_v0 = vld [vmem:[%s34_s0] sm:$0x7f] }
   0x2   :  { %v4_v1 = vld [vmem:[%s35_s1] sm:$0x7f] }
   0x3   :  { %v7_v2 = vmul.f32 %v4_v1, %v3_v0 }
   0x5   :  { %9 = vst [vmem:[%s36_s2] sm:$0xff] %v7_v2 }

// kernel: gcn_forward.3
= control target key start
LH: loop header
LB: loop body
LE: loop exit
PB: predicated region body
PF: predicated region fallthrough
CT: control target
= control target key end

     0   :  { %s464_s9 = smov 0   ;;  %s508_s0 = inlined_call_operand.vmem [shape: bf16[256,128], index: 0, kind: input, shape index: {}]   ;;  %s509_s1 = inlined_call_operand.vmem [shape: bf16[128,128], index: 1, kind: input, shape index: {}]   ;;  %s510_s2 = inlined_call_operand.vmem [shape: bf16[256,128], index: 2, kind: output, shape index: {}]  }
   0x1 LB: > { %s353_s10 = sadd.s32 4294967295, %s447_s9   ;;  %p357_p0 = scmp.ge.s32.totalorder %s447_s9, 1  ;;  %s447_s9 = sphi %s464_s9, %s12_s9  }
   0x2   : > { %p113_p1 = scmp.lt.s32.totalorder %s447_s9, 9 }
   0x4   : > { %p114_p2 = pnand %p357_p0, %p113_p1 }
   0x5   : > { %s358_s13 = sshll.u32 (!%p114_p2), %s353_s10, 2 }
   0x6   : > { %117 = sbr.rel (%p114_p2) target bundleno = 246 (0xf6), region = 28  ;;  %p136_p3 = scmp.lt.s32.totalorder (!%p114_p2), %s358_s13, 31 }
   0xb   : > { %v431_v0 = vld [vmem:[%s509_s1 + $0x38] sm:$0xff]   ;;  %v432_v1 = vld [vmem:[%s509_s1 + $0x30] sm:$0xff]   ;;  %s512_s13 = smov (!%p136_p3, %s358_s13), 31  ;;  %v433_v2 = vld [vmem:[%s509_s1 + $0x28] sm:$0xff]  }
   0xc   : > { %403 = vmatprep.subr.bf16.mxu0 %v431_v0  ;;  %s359_s18 = sshll.u32 %s512_s13, 2  ;;  %v434_v3 = vld [vmem:[%s509_s1 + $0x20] sm:$0xff]   ;;  %v435_v5 = vld [vmem:[%s509_s1 + $0x18] sm:$0xff]   ;;  %v436_v6 = vld [vmem:[%s509_s1 + $0x10] sm:$0xff]  }
   0xd   : > { %404 = vmatpush3.bf16.msra.mxu0 %v431_v0  ;;  %s139_s21 = scalar_lea.vmem %s508_s0, %s359_s18  ;;  %v437_v7 = vld [vmem:[%s509_s1 + $0x8] sm:$0xff]   ;;  %v438_v8 = vld [vmem:[%s509_s1] sm:$0xff]   ;;  %s145_s6 = scalar_lea.vmem %s510_s2, %s359_s18 }
   0xe   : > { %405 = vmatprep.subr.bf16.mxu0 %v432_v1  ;;  %v439_v4 = vld [vmem:[%s139_s21] sm:$0xff]   ;;  %v440_v9 = vld [vmem:[%s139_s21 + $0x8] sm:$0xff]  }
   0xf   : > { %419 = vmatprep.mubr.bf16.mxu0 %v439_v4 }
  0x11   : > { %406 = vmatpush3.bf16.msra.mxu0 %v432_v1 }
  0x12   : > { %407 = vmatprep.subr.bf16.mxu0 %v433_v2 }
  0x15   : > { %408 = vmatpush3.bf16.msra.mxu0 %v433_v2 }
  0x16   : > { %409 = vmatprep.subr.bf16.mxu0 %v434_v3 }
  0x19   : > { %410 = vmatpush3.bf16.msra.mxu0 %v434_v3 }
  0x1a   : > { %411 = vmatprep.subr.bf16.mxu0 %v435_v5 }
  0x1d   : > { %412 = vmatpush3.bf16.msra.mxu0 %v435_v5 }
  0x1e   : > { %413 = vmatprep.subr.bf16.mxu0 %v436_v6 }
  0x21   : > { %414 = vmatpush3.bf16.msra.mxu0 %v436_v6 }
  0x22   : > { %415 = vmatprep.subr.bf16.mxu0 %v437_v7 }
  0x25   : > { %416 = vmatpush3.bf16.msra.mxu0 %v437_v7 }
  0x26   : > { %417 = vmatprep.subr.bf16.mxu0 %v438_v8 }
  0x29   : > { %418 = vmatpush3.bf16.msra.mxu0 %v438_v8 }
  0x2c   : > { %420 = vmatmul.mubr.bf16.vlgmr.msra.gmra.mxu0 %v440_v9 }
  0xec   : > { %v421_v10 = vpop.f32.mrf.mxu0 }
  0xee   : > { %v262_v11 = vpop.f32.mrf.mxu0 }
  0xf0   : > { %v422_v12 = vpop.f32.mrf.mxu0 }
  0xf1   : > { %v390_v13 = vpack.c.bf16 %v422_v12, %v421_v10 }
  0xf2   : > { %v265_v14 = vpop.f32.mrf.mxu0 }
  0xf3   : > { %392 = vst [vmem:[%s145_s6 + $0x8] sm:$0xff] %v390_v13   ;;  %v385_v15 = vpack.c.bf16 %v265_v14, %v262_v11 }
  0xf5   : > { %386 = vst [vmem:[%s145_s6] sm:$0xff] %v385_v15  }
  0xf6 PF: > { %s12_s9 = sadd.s32 1, %s447_s9  }
  0xf7   : > { %p9_p4 = scmp.ge.s32.totalorder %s12_s9, 10  }
  0xf9   :  { %11 = sbr.rel (!%p9_p4) target bundleno = 1 (0x1), region = 58 }

// kernel: gcn_forward.5
= control target key start
LH: loop header
LB: loop body
LE: loop exit
PB: predicated region body
PF: predicated region fallthrough
CT: control target
= control target key end

     0   :  { %s732_s12 = smov 0   ;;  %s734_s13 = smov 0   ;;  %s852_s0 = inlined_call_operand.vmem [shape: bf16[256,256], index: 0, kind: input, shape index: {}]   ;;  %s853_s1 = inlined_call_operand.vmem [shape: bf16[256,128], index: 1, kind: input, shape index: {}]   ;;  %s854_s2 = inlined_call_operand.vmem [shape: f32[1,128], index: 2, kind: input, shape index: {}]   ;;  %s855_s3 = inlined_call_operand.vmem [shape: f32[256,128], index: 3, kind: output, shape index: {}]  }
   0x1   :  { %s736_s14 = smov 0   ;;  %s738_s15 = smov 0  }
   0x2   :  { %s740_s16 = smov 0   ;;  %s742_s17 = smov 0  }
   0x3   :  { %s744_s18 = smov 0  }
   0x4 LB: > { %s22_s19 = sadd.s32 1, %s701_s16  ;;  %s25_s20 = sadd.s32 1, %s705_s17  ;;  %s709_s18 = sphi %s744_s18, %s13_s18   ;;  %s705_s17 = sphi %s742_s17, %s861_s17   ;;  %s701_s16 = sphi %s740_s16, %s860_s16   ;;  %s697_s15 = sphi %s738_s15, %s859_s15   ;;  %s693_s14 = sphi %s736_s14, %s858_s14   ;;  %s689_s13 = sphi %s734_s13, %s857_s13   ;;  %s685_s12 = sphi %s732_s12, %s856_s12  }
   0x5   : > { %p23_p0 = scmp.ge.s32.totalorder %s22_s19, 2  ;;  %p41_p1 = scmp.ne.s32.totalorder %s689_s13, %s685_s12 }
   0x6   : > { %p42_p2 = scmp.eq.s32.totalorder %s709_s18, 0  ;;  %s34_s24 = sadd.s32 1, %s689_s13 }
   0x7   : > { %s863_s19 = smov (%p23_p0, %s22_s19), 0  ;;  %s865_s20 = smov (!%p23_p0, %s25_s20), %s705_s17 }
   0x8   : > { %p43_p3 = por %p42_p2, %p41_p1  ;;  %p27_p4 = scmp.ge.s32.totalorder %s865_s20, 8 }
   0x9   : > { %s30_s21 = ssub.s32 %s701_s16, %s863_s19  ;;  %p531_p6 = scmp.ge.s32.totalorder %s709_s18, 16 }
   0xa   : > { %s867_s20 = smov (%p27_p4, %s865_s20), 0 }
   0xb   : > { %s29_s22 = ssub.s32 %s705_s17, %s867_s20  ;;  %143 = sbr.rel (%p531_p6) target bundleno = 24 (0x18), region = 20 }
   0xc   : > { %s31_s23 = sor.u32 %s30_s21, %s29_s22 }
   0xd   : > { %p32_p5 = scmp.eq.s32.totalorder %s31_s23, 0 }
   0xf   : > { %s783_s25 = scalar_select %p32_p5, %s689_s13, %s34_s24  }
  0x10   : > { %146 = sbr.rel (!%p43_p3) target bundleno = 24 (0x18), region = 24  ;;  %s148_s26 = sand.u32 (%p43_p3), 1, %s689_s13  }
  0x11   : > { %s557_s27 = sshll.u32 (%p43_p3), %s705_s17, 3  ;;  %s532_s28 = sshll.u32 (%p43_p3), %s148_s26, 4 }
  0x12   : > { %s153_s29 = sadd.s32 (%p43_p3), %s701_s16, %s557_s27  ;;  %s150_s7 = scalar_lea.vmem (%p43_p3), [#allocation3], %s532_s28 }
  0x13   : > { %s535_s30 = sshll.u32 (%p43_p3), %s153_s29, 2 }
  0x14   : > { %s155_s6 = scalar_lea.vmem (%p43_p3), %s852_s0, %s535_s30 }
  0x15   : > { %v172_v0 = vld [vmem:[%s155_s6] sm:$0xf]  ;;  %v174_v1 = vld [vmem:[%s155_s6 + $0x8] sm:$0xf]  ;;  %v176_v2 = vld [vmem:[%s155_s6 + $0x10] sm:$0xf] }
  0x16   : > { %173 = vst [vmem:[%s150_s7] sm:$0xf] %v172_v0  ;;  %175 = vst [vmem:[%s150_s7 + $0x4] sm:$0xf] %v174_v1  ;;  %v178_v3 = vld [vmem:[%s155_s6 + $0x18] sm:$0xf] }
  0x17   : > { %177 = vst [vmem:[%s150_s7 + $0x8] sm:$0xf] %v176_v2  ;;  %179 = vst [vmem:[%s150_s7 + $0xc] sm:$0xf] %v178_v3 }
  0x18 PF: > { %p536_p7 = scmp.ge.s32.totalorder %s709_s18, 1  ;;  %p219_p8 = scmp.lt.s32.totalorder %s709_s18, 17 }
  0x1a   : > { %p220_p9 = pnand %p536_p7, %p219_p8 }
  0x1b   : > { %s226_s8 = sand.u32 (!%p220_p9), 1, %s685_s12   ;;  %s538_s9 = sshll.u32 (!%p220_p9), %s693_s14, 4 }
  0x1c   : > { %223 = sbr.rel (%p220_p9) target bundleno = 289 (0x121), region = 69  ;;  %s796_s10 = sshll.u32 (!%p220_p9), %s226_s8, 4 }
  0x1d   : > { %p256_p10 = scmp.lt.s32.totalorder (!%p220_p9), %s538_s9, 31  ;;  %s540_s11 = sshll.u32 (!%p220_p9), %s697_s15, 2 }
  0x1e   : > { %p262_p11 = scmp.lt.s32.totalorder (!%p220_p9), %s540_s11, 31  ;;  %s228_s29 = scalar_lea.vmem (!%p220_p9), [#allocation3], %s796_s10 }
  0x1f   : > { %p542_p12 = scmp.ne.s32.totalorder (!%p220_p9), %s693_s14, 0 }
  0x21   : > { %s869_s9 = smov (!%p256_p10, %s538_s9), 31  ;;  %s871_s11 = smov (!%p262_p11, %s540_s11), 31 }
  0x22   : > { %s539_s21 = sshll.u32 %s869_s9, 2  ;;  %s541_s26 = sshll.u32 %s871_s11, 3 }
  0x23   : > { %s802_s24 = scalar_lea.vmem %s853_s1, %s539_s21  ;;  %s807_s12 = scalar_lea.vmem %s855_s3, %s541_s26 }
  0x24   : > { %271 = sbr.rel (%p542_p12) target bundleno = 44 (0x2c), region = 77 }
  0x29   : > { %v711_v4 = vmov 0.0  }
  0x2a   : > { %272 = vst [vmem:[#allocation2 + $0x10] sm:$0xff] %v711_v4  ;;  %273 = vst [vmem:[#allocation2] sm:$0xff] %v711_v4 }
  0x2b   : > { %274 = vst [vmem:[#allocation2 + $0x18] sm:$0xff] %v711_v4  ;;  %275 = vst [vmem:[#allocation2 + $0x8] sm:$0xff] %v711_v4 }
  0x2c PF: > { %v645_v5 = vld [vmem:[%s802_s24 + $0x38] sm:$0xff]   ;;  %v646_v6 = vld [vmem:[%s802_s24 + $0x30] sm:$0xff]   ;;  %v647_v7 = vld [vmem:[%s802_s24 + $0x28] sm:$0xff]   ;;  %p553_p13 = scmp.ne.s32.totalorder %s693_s14, 1 }
  0x2d   : > { %568 = vmatprep.subr.bf16.mxu0 %v645_v5  ;;  %v648_v8 = vld [vmem:[%s802_s24 + $0x20] sm:$0xff]   ;;  %v649_v10 = vld [vmem:[%s802_s24 + $0x18] sm:$0xff]   ;;  %v650_v11 = vld [vmem:[%s802_s24 + $0x10] sm:$0xff]  }
  0x2e   : > { %569 = vmatpush3.bf16.msra.mxu0 %v645_v5  ;;  %v653_v9 = vld [vmem:[%s228_s29] sm:$0xff]   ;;  %v651_v12 = vld [vmem:[%s802_s24 + $0x8] sm:$0xff]  }
  0x2f   : > { %570 = vmatprep.subr.bf16.mxu0 %v646_v6  ;;  %584 = vmatprep.mubr.bf16.mxu0 %v653_v9  ;;  %v652_v13 = vld [vmem:[%s802_s24] sm:$0xff]   ;;  %v654_v14 = vld [vmem:[%s228_s29 + $0x8] sm:$0xff]  }
  0x31   : > { %v276_v17 = vld [vmem:[#allocation2 + $0x10] sm:$0xff]  ;;  %v277_v23 = vld [vmem:[#allocation2] sm:$0xff] }
  0x32   : > { %571 = vmatpush3.bf16.msra.mxu0 %v646_v6  ;;  %v278_v15 = vld [vmem:[#allocation2 + $0x18] sm:$0xff]  ;;  %v279_v20 = vld [vmem:[#allocation2 + $0x8] sm:$0xff] }
  0x33   : > { %572 = vmatprep.subr.bf16.mxu0 %v647_v7 }
  0x36   : > { %573 = vmatpush3.bf16.msra.mxu0 %v647_v7 }
  0x37   : > { %574 = vmatprep.subr.bf16.mxu0 %v648_v8 }
  0x3a   : > { %575 = vmatpush3.bf16.msra.mxu0 %v648_v8 }
  0x3b   : > { %576 = vmatprep.subr.bf16.mxu0 %v649_v10 }
  0x3e   : > { %577 = vmatpush3.bf16.msra.mxu0 %v649_v10 }
  0x3f   : > { %578 = vmatprep.subr.bf16.mxu0 %v650_v11 }
  0x42   : > { %579 = vmatpush3.bf16.msra.mxu0 %v650_v11 }
  0x43   : > { %580 = vmatprep.subr.bf16.mxu0 %v651_v12 }
  0x46   : > { %581 = vmatpush3.bf16.msra.mxu0 %v651_v12 }
  0x47   : > { %582 = vmatprep.subr.bf16.mxu0 %v652_v13 }
  0x4a   : > { %583 = vmatpush3.bf16.msra.mxu0 %v652_v13 }
  0x4d   : > { %585 = vmatmul.mubr.bf16.vlgmr.msra.gmra.mxu0 %v654_v14 }
 0x10d   : > { %v586_v16 = vpop.f32.mrf.mxu0 }
 0x10e   : > { %v411_v18 = vadd.f32 %v586_v16, %v278_v15 }
 0x10f   : > { %v394_v19 = vpop.f32.mrf.mxu0 }
 0x110   : > { %415 = vst [vmem:[#allocation2 + $0x18] sm:$0xff] %v411_v18  ;;  %v409_v21 = vadd.f32 %v394_v19, %v276_v17 }
 0x111   : > { %v587_v22 = vpop.f32.mrf.mxu0 }
 0x112   : > { %413 = vst [vmem:[#allocation2 + $0x10] sm:$0xff] %v409_v21  ;;  %v412_v24 = vadd.f32 %v587_v22, %v279_v20  ;;  %420 = sbr.rel (%p553_p13) target bundleno = 289 (0x121), region = 81 }
 0x113   : > { %v397_v25 = vpop.f32.mrf.mxu0 }
 0x114   : > { %416 = vst [vmem:[#allocation2 + $0x8] sm:$0xff] %v412_v24  ;;  %v410_v26 = vadd.f32 %v397_v25, %v277_v23 }
 0x116   : > { %414 = vst [vmem:[#allocation2] sm:$0xff] %v410_v26 }
 0x117   : > { %v554_v28 = vld [vmem:[%s854_s2] ss:$0 sm:$0xff]  ;;  %v423_v32 = vld [vmem:[#allocation2 + $0x18] sm:$0xff] }
 0x118   : > { %v434_v34 = vadd.f32 %v554_v28, %v423_v32 }
 0x119   : > { %v421_v27 = vld [vmem:[#allocation2 + $0x10] sm:$0xff] }
 0x11a   : > { %v432_v30 = vadd.f32 %v554_v28, %v421_v27  ;;  %438 = vst [vmem:[%s807_s12 + $0x10] sm:$0xff] %v434_v34 }
 0x11b   : > { %v424_v33 = vld [vmem:[#allocation2 + $0x8] sm:$0xff] }
 0x11c   : > { %v435_v35 = vadd.f32 %v554_v28, %v424_v33  ;;  %436 = vst [vmem:[%s807_s12] sm:$0xff] %v432_v30 }
 0x11d   : > { %v422_v29 = vld [vmem:[#allocation2] sm:$0xff] }
 0x11e   : > { %v433_v31 = vadd.f32 %v554_v28, %v422_v29  ;;  %439 = vst [vmem:[%s807_s12 + $0x18] sm:$0xff] %v435_v35 }
 0x120   : > { %437 = vst [vmem:[%s807_s12 + $0x8] sm:$0xff] %v433_v31 }
 0x121 PF: > { %s13_s18 = sadd.s32 1, %s709_s18   ;;  %s856_s12 = smov %s689_s13 }
 0x122   : > { %p10_p0 = scmp.ge.s32.totalorder %s13_s18, 18   ;;  %s857_s13 = smov %s783_s25 }
 0x123   : > { %s858_s14 = smov %s701_s16  ;;  %s859_s15 = smov %s705_s17 }
 0x124   : > { %s860_s16 = smov %s863_s19  ;;  %s861_s17 = smov %s867_s20 }
 0x125   :  { %12 = sbr.rel (!%p10_p0) target bundleno = 4 (0x4), region = 119 }

// kernel: gcn_forward.4
= control target key start
LH: loop header
LB: loop body
LE: loop exit
PB: predicated region body
PF: predicated region fallthrough
CT: control target
= control target key end

     0   :  { %s964_s15 = smov 0   ;;  %s966_s16 = smov 0   ;;  %s1106_s0 = inlined_call_operand.vmem [shape: bf16[256,256], index: 0, kind: input, shape index: {}]   ;;  %s1107_s1 = inlined_call_operand.vmem [shape: bf16[256,128], index: 1, kind: input, shape index: {}]   ;;  %s1108_s2 = inlined_call_operand.vmem [shape: f32[1,128], index: 2, kind: input, shape index: {}]   ;;  %s1109_s3 = inlined_call_operand.vmem [shape: bf16[128,128], index: 3, kind: input, shape index: {}]   ;;  %s1110_s4 = inlined_call_operand.vmem [shape: bf16[256,128], index: 4, kind: output, shape index: {}]  }
   0x1   :  { %s968_s17 = smov 0   ;;  %s970_s18 = smov 0  }
   0x2   :  { %s972_s19 = smov 0   ;;  %s974_s20 = smov 0  }
   0x3   :  { %s976_s21 = smov 0  }
   0x4 LB: > { %s23_s22 = sadd.s32 1, %s928_s19  ;;  %s26_s23 = sadd.s32 1, %s932_s20  ;;  %s936_s21 = sphi %s976_s21, %s14_s21   ;;  %s932_s20 = sphi %s974_s20, %s1116_s20   ;;  %s928_s19 = sphi %s972_s19, %s1115_s19   ;;  %s924_s18 = sphi %s970_s18, %s1114_s18   ;;  %s920_s17 = sphi %s968_s17, %s1113_s17   ;;  %s916_s16 = sphi %s966_s16, %s1112_s16   ;;  %s912_s15 = sphi %s964_s15, %s1111_s15  }
   0x5   : > { %p24_p0 = scmp.ge.s32.totalorder %s23_s22, 2  ;;  %p42_p1 = scmp.ne.s32.totalorder %s916_s16, %s912_s15 }
   0x6   : > { %p43_p2 = scmp.eq.s32.totalorder %s936_s21, 0  ;;  %s35_s27 = sadd.s32 1, %s916_s16 }
   0x7   : > { %s1118_s22 = smov (%p24_p0, %s23_s22), 0  ;;  %s1120_s23 = smov (!%p24_p0, %s26_s23), %s932_s20 }
   0x8   : > { %p44_p3 = por %p43_p2, %p42_p1  ;;  %p28_p4 = scmp.ge.s32.totalorder %s1120_s23, 8 }
   0x9   : > { %s31_s24 = ssub.s32 %s928_s19, %s1118_s22  ;;  %p693_p6 = scmp.ge.s32.totalorder %s936_s21, 16 }
   0xa   : > { %s1122_s23 = smov (%p28_p4, %s1120_s23), 0 }
   0xb   : > { %s30_s25 = ssub.s32 %s932_s20, %s1122_s23  ;;  %168 = sbr.rel (%p693_p6) target bundleno = 24 (0x18), region = 24 }
   0xc   : > { %s32_s26 = sor.u32 %s31_s24, %s30_s25 }
   0xd   : > { %p33_p5 = scmp.eq.s32.totalorder %s32_s26, 0 }
   0xf   : > { %s1015_s28 = scalar_select %p33_p5, %s916_s16, %s35_s27  }
  0x10   : > { %171 = sbr.rel (!%p44_p3) target bundleno = 24 (0x18), region = 28  ;;  %s173_s29 = sand.u32 (%p44_p3), 1, %s916_s16  }
  0x11   : > { %s731_s30 = sshll.u32 (%p44_p3), %s932_s20, 3  ;;  %s694_s5 = sshll.u32 (%p44_p3), %s173_s29, 4 }
  0x12   : > { %s178_s6 = sadd.s32 (%p44_p3), %s928_s19, %s731_s30  ;;  %s175_s11 = scalar_lea.vmem (%p44_p3), [#allocation3], %s694_s5 }
  0x13   : > { %s697_s7 = sshll.u32 (%p44_p3), %s178_s6, 2 }
  0x14   : > { %s180_s10 = scalar_lea.vmem (%p44_p3), %s1106_s0, %s697_s7 }
  0x15   : > { %v197_v0 = vld [vmem:[%s180_s10] sm:$0xf]  ;;  %v199_v1 = vld [vmem:[%s180_s10 + $0x8] sm:$0xf]  ;;  %v201_v2 = vld [vmem:[%s180_s10 + $0x10] sm:$0xf] }
  0x16   : > { %198 = vst [vmem:[%s175_s11] sm:$0xf] %v197_v0  ;;  %200 = vst [vmem:[%s175_s11 + $0x4] sm:$0xf] %v199_v1  ;;  %v203_v3 = vld [vmem:[%s180_s10 + $0x18] sm:$0xf] }
  0x17   : > { %202 = vst [vmem:[%s175_s11 + $0x8] sm:$0xf] %v201_v2  ;;  %204 = vst [vmem:[%s175_s11 + $0xc] sm:$0xf] %v203_v3 }
  0x18 PF: > { %p698_p7 = scmp.ge.s32.totalorder %s936_s21, 1  ;;  %p244_p8 = scmp.lt.s32.totalorder %s936_s21, 17 }
  0x1a   : > { %p245_p9 = pnand %p698_p7, %p244_p8 }
  0x1b   : > { %s251_s12 = sand.u32 (!%p245_p9), 1, %s912_s15   ;;  %s700_s13 = sshll.u32 (!%p245_p9), %s920_s17, 4 }
  0x1c   : > { %248 = sbr.rel (%p245_p9) target bundleno = 514 (0x202), region = 73  ;;  %s1028_s14 = sshll.u32 (!%p245_p9), %s251_s12, 4 }
  0x1d   : > { %p283_p10 = scmp.lt.s32.totalorder (!%p245_p9), %s700_s13, 31  ;;  %s702_s24 = sshll.u32 (!%p245_p9), %s924_s18, 2 }
  0x1e   : > { %p289_p11 = scmp.lt.s32.totalorder (!%p245_p9), %s702_s24, 31  ;;  %s253_s7 = scalar_lea.vmem (!%p245_p9), [#allocation3], %s1028_s14 }
  0x1f   : > { %p704_p12 = scmp.ne.s32.totalorder (!%p245_p9), %s920_s17, 0 }
  0x21   : > { %s1124_s13 = smov (!%p283_p10, %s700_s13), 31  ;;  %s1126_s24 = smov (!%p289_p11, %s702_s24), 31 }
  0x22   : > { %s701_s25 = sshll.u32 %s1124_s13, 2  ;;  %s703_s30 = sshll.u32 %s1126_s24, 2 }
  0x23   : > { %s1034_s29 = scalar_lea.vmem %s1107_s1, %s701_s25  ;;  %s1039_s15 = scalar_lea.vmem %s1110_s4, %s703_s30 }
  0x24   : > { %298 = sbr.rel (%p704_p12) target bundleno = 44 (0x2c), region = 81 }
  0x29   : > { %v938_v4 = vmov 0.0  }
  0x2a   : > { %299 = vst [vmem:[#allocation2 + $0x10] sm:$0xff] %v938_v4  ;;  %300 = vst [vmem:[#allocation2] sm:$0xff] %v938_v4 }
  0x2b   : > { %301 = vst [vmem:[#allocation2 + $0x18] sm:$0xff] %v938_v4  ;;  %302 = vst [vmem:[#allocation2 + $0x8] sm:$0xff] %v938_v4 }
  0x2c PF: > { %v864_v5 = vld [vmem:[%s1034_s29 + $0x38] sm:$0xff]   ;;  %v865_v6 = vld [vmem:[%s1034_s29 + $0x30] sm:$0xff]   ;;  %v866_v7 = vld [vmem:[%s1034_s29 + $0x28] sm:$0xff]   ;;  %p715_p13 = scmp.ne.s32.totalorder %s920_s17, 1 }
  0x2d   : > { %767 = vmatprep.subr.bf16.mxu0 %v864_v5  ;;  %v867_v8 = vld [vmem:[%s1034_s29 + $0x20] sm:$0xff]   ;;  %v868_v10 = vld [vmem:[%s1034_s29 + $0x18] sm:$0xff]   ;;  %v869_v11 = vld [vmem:[%s1034_s29 + $0x10] sm:$0xff]  }
  0x2e   : > { %768 = vmatpush3.bf16.msra.mxu0 %v864_v5  ;;  %v872_v9 = vld [vmem:[%s253_s7] sm:$0xff]   ;;  %v870_v12 = vld [vmem:[%s1034_s29 + $0x8] sm:$0xff]  }
  0x2f   : > { %769 = vmatprep.subr.bf16.mxu0 %v865_v6  ;;  %783 = vmatprep.mubr.bf16.mxu0 %v872_v9  ;;  %v871_v13 = vld [vmem:[%s1034_s29] sm:$0xff]   ;;  %v873_v14 = vld [vmem:[%s253_s7 + $0x8] sm:$0xff]  }
  0x31   : > { %v303_v17 = vld [vmem:[#allocation2 + $0x10] sm:$0xff]  ;;  %v304_v23 = vld [vmem:[#allocation2] sm:$0xff] }
  0x32   : > { %770 = vmatpush3.bf16.msra.mxu0 %v865_v6  ;;  %v305_v15 = vld [vmem:[#allocation2 + $0x18] sm:$0xff]  ;;  %v306_v20 = vld [vmem:[#allocation2 + $0x8] sm:$0xff] }
  0x33   : > { %771 = vmatprep.subr.bf16.mxu0 %v866_v7 }
  0x36   : > { %772 = vmatpush3.bf16.msra.mxu0 %v866_v7 }
  0x37   : > { %773 = vmatprep.subr.bf16.mxu0 %v867_v8 }
  0x3a   : > { %774 = vmatpush3.bf16.msra.mxu0 %v867_v8 }
  0x3b   : > { %775 = vmatprep.subr.bf16.mxu0 %v868_v10 }
  0x3e   : > { %776 = vmatpush3.bf16.msra.mxu0 %v868_v10 }
  0x3f   : > { %777 = vmatprep.subr.bf16.mxu0 %v869_v11 }
  0x42   : > { %778 = vmatpush3.bf16.msra.mxu0 %v869_v11 }
  0x43   : > { %779 = vmatprep.subr.bf16.mxu0 %v870_v12 }
  0x46   : > { %780 = vmatpush3.bf16.msra.mxu0 %v870_v12 }
  0x47   : > { %781 = vmatprep.subr.bf16.mxu0 %v871_v13 }
  0x4a   : > { %782 = vmatpush3.bf16.msra.mxu0 %v871_v13 }
  0x4d   : > { %784 = vmatmul.mubr.bf16.vlgmr.msra.gmra.mxu0 %v873_v14 }
 0x10d   : > { %v785_v16 = vpop.f32.mrf.mxu0 }
 0x10e   : > { %v438_v18 = vadd.f32 %v785_v16, %v305_v15 }
 0x10f   : > { %v421_v19 = vpop.f32.mrf.mxu0 }
 0x110   : > { %442 = vst [vmem:[#allocation2 + $0x18] sm:$0xff] %v438_v18  ;;  %v436_v21 = vadd.f32 %v421_v19, %v303_v17 }
 0x111   : > { %v786_v22 = vpop.f32.mrf.mxu0 }
 0x112   : > { %440 = vst [vmem:[#allocation2 + $0x10] sm:$0xff] %v436_v21  ;;  %v439_v24 = vadd.f32 %v786_v22, %v306_v20  ;;  %447 = sbr.rel (%p715_p13) target bundleno = 514 (0x202), region = 85 }
 0x113   : > { %v424_v25 = vpop.f32.mrf.mxu0 }
 0x114   : > { %443 = vst [vmem:[#allocation2 + $0x8] sm:$0xff] %v439_v24  ;;  %v437_v26 = vadd.f32 %v424_v25, %v304_v23 }
 0x116   : > { %441 = vst [vmem:[#allocation2] sm:$0xff] %v437_v26 }
 0x117   : > { %v874_v27 = vld [vmem:[%s1109_s3 + $0x38] sm:$0xff]   ;;  %v875_v28 = vld [vmem:[%s1109_s3 + $0x30] sm:$0xff]   ;;  %v876_v29 = vld [vmem:[%s1109_s3 + $0x28] sm:$0xff]  }
 0x118   : > { %787 = vmatprep.subr.bf16.mxu0 %v874_v27  ;;  %v877_v30 = vld [vmem:[%s1109_s3 + $0x20] sm:$0xff]   ;;  %v878_v38 = vld [vmem:[%s1109_s3 + $0x18] sm:$0xff]   ;;  %v879_v40 = vld [vmem:[%s1109_s3 + $0x10] sm:$0xff]  }
 0x119   : > { %788 = vmatpush3.bf16.msra.mxu0 %v874_v27  ;;  %v448_v31 = vld [vmem:[#allocation2 + $0x10] sm:$0xff]  ;;  %v716_v33 = vld [vmem:[%s1108_s2] ss:$0 sm:$0xff]  ;;  %v450_v41 = vld [vmem:[#allocation2 + $0x18] sm:$0xff] }
 0x11a   : > { %789 = vmatprep.subr.bf16.mxu0 %v875_v28  ;;  %v459_v34 = vadd.f32 %v716_v33, %v448_v31  ;;  %v880_v43 = vld [vmem:[%s1109_s3 + $0x8] sm:$0xff]   ;;  %v461_v44 = vadd.f32 %v716_v33, %v450_v41  ;;  %v881_v46 = vld [vmem:[%s1109_s3] sm:$0xff]  }
 0x11b   : > { %v451_v42 = vld [vmem:[#allocation2 + $0x8] sm:$0xff] }
 0x11c   : > { %v463_v36 = vmax.f32 %v459_v34, 0.0  ;;  %v462_v45 = vadd.f32 %v716_v33, %v451_v42  ;;  %v465_v47 = vmax.f32 %v461_v44, 0.0 }
 0x11d   : > { %790 = vmatpush3.bf16.msra.mxu0 %v875_v28  ;;  %v449_v32 = vld [vmem:[#allocation2] sm:$0xff] }
 0x11e   : > { %791 = vmatprep.subr.bf16.mxu0 %v876_v29  ;;  %v460_v35 = vadd.f32 %v716_v33, %v449_v32  ;;  %v466_v48 = vmax.f32 %v462_v45, 0.0 }
 0x120   : > { %v464_v37 = vmax.f32 %v460_v35, 0.0  ;;  %v468_v49 = vpack.c.bf16 %v466_v48, %v465_v47 }
 0x121   : > { %792 = vmatpush3.bf16.msra.mxu0 %v876_v29 }
 0x122   : > { %793 = vmatprep.subr.bf16.mxu0 %v877_v30  ;;  %v467_v39 = vpack.c.bf16 %v464_v37, %v463_v36 }
 0x124   : > { %803 = vmatprep.mubr.bf16.mxu0 %v467_v39 }
 0x125   : > { %794 = vmatpush3.bf16.msra.mxu0 %v877_v30 }
 0x126   : > { %795 = vmatprep.subr.bf16.mxu0 %v878_v38 }
 0x129   : > { %796 = vmatpush3.bf16.msra.mxu0 %v878_v38 }
 0x12a   : > { %797 = vmatprep.subr.bf16.mxu0 %v879_v40 }
 0x12d   : > { %798 = vmatpush3.bf16.msra.mxu0 %v879_v40 }
 0x12e   : > { %799 = vmatprep.subr.bf16.mxu0 %v880_v43 }
 0x131   : > { %800 = vmatpush3.bf16.msra.mxu0 %v880_v43 }
 0x132   : > { %801 = vmatprep.subr.bf16.mxu0 %v881_v46 }
 0x135   : > { %802 = vmatpush3.bf16.msra.mxu0 %v881_v46 }
 0x138   : > { %804 = vmatmul.mubr.bf16.vlgmr.msra.gmra.mxu0 %v468_v49 }
 0x1f8   : > { %v805_v50 = vpop.f32.mrf.mxu0 }
 0x1fa   : > { %v567_v51 = vpop.f32.mrf.mxu0 }
 0x1fc   : > { %v806_v52 = vpop.f32.mrf.mxu0 }
 0x1fd   : > { %v744_v53 = vpack.c.bf16 %v806_v52, %v805_v50 }
 0x1fe   : > { %v570_v54 = vpop.f32.mrf.mxu0 }
 0x1ff   : > { %746 = vst [vmem:[%s1039_s15 + $0x8] sm:$0xff] %v744_v53   ;;  %v739_v55 = vpack.c.bf16 %v570_v54, %v567_v51 }
 0x201   : > { %740 = vst [vmem:[%s1039_s15] sm:$0xff] %v739_v55  }
 0x202 PF: > { %s14_s21 = sadd.s32 1, %s936_s21   ;;  %s1111_s15 = smov %s916_s16 }
 0x203   : > { %p11_p0 = scmp.ge.s32.totalorder %s14_s21, 18   ;;  %s1112_s16 = smov %s1015_s28 }
 0x204   : > { %s1113_s17 = smov %s928_s19  ;;  %s1114_s18 = smov %s932_s20 }
 0x205   : > { %s1115_s19 = smov %s1118_s22  ;;  %s1116_s20 = smov %s1122_s23 }
 0x206   :  { %13 = sbr.rel (!%p11_p0) target bundleno = 4 (0x4), region = 123 }

</bundles_post_ra>
